<compile_context>
chip_gen: v7x
topology: tpu7x:2x2x1
jax: 0.10.0
libtpu: 0.0.40
codegen_flags: <defaults>
</compile_context>

<pallas_src>
import functools

import jax
import jax.numpy as jnp
from jax.experimental import pallas as pl
from jax.experimental.pallas import tpu as pltpu

_EPS = 1e-5


def _round_up(x, m):
    return (x + m - 1) // m * m


# ----------------------------------------------------------------------------
# Pallas kernel: single-matmul conv -> two-pass BatchNorm -> ReLU -> +residual.
# Grid = (pass, m_tile); pass 0 accumulates stats, pass 1 writes the output.
# ----------------------------------------------------------------------------
def _conv_bn_kernel(x_ref, w_ref, g_ref, b_ref, *rest,
                    apply_relu, add_residual, inv_rows, eps):
    if add_residual:
        res_ref, out_ref, sum_ref, sq_ref, scale_ref, shift_ref = rest
    else:
        out_ref, sum_ref, sq_ref, scale_ref, shift_ref = rest

    p = pl.program_id(0)   # 0 = stats pass, 1 = normalize/write pass
    m = pl.program_id(1)   # M tile index

    # Convolution as ONE MXU matmul: K = taps * Cin (bf16 in, f32 accumulate).
    acc = jnp.dot(x_ref[...], w_ref[...], preferred_element_type=jnp.float32)

    @pl.when((p == 0) & (m == 0))
    def _init():
        sum_ref[...] = jnp.zeros_like(sum_ref)
        sq_ref[...] = jnp.zeros_like(sq_ref)

    @pl.when(p == 0)
    def _stats():
        sum_ref[...] += jnp.sum(acc, axis=0, keepdims=True)
        sq_ref[...] += jnp.sum(acc * acc, axis=0, keepdims=True)
        # Deterministic placeholder; overwritten by pass 1.
        out_ref[...] = jnp.zeros_like(out_ref)

    @pl.when((p == 1) & (m == 0))
    def _finalize_stats():
        mean = sum_ref[...] * inv_rows
        var = jnp.maximum(sq_ref[...] * inv_rows - mean * mean, 0.0)
        inv_std = jax.lax.rsqrt(var + eps)        # EUP; computed once per conv
        scale = g_ref[...] * inv_std              # fold gamma into one scale
        scale_ref[...] = scale
        shift_ref[...] = b_ref[...] - mean * scale

    @pl.when(p == 1)
    def _write():
        y = acc * scale_ref[...] + shift_ref[...]
        if apply_relu:
            y = jnp.maximum(y, 0.0)
        if add_residual:
            y = y + res_ref[...]
        out_ref[...] = y.astype(out_ref.dtype)


def _conv_bn_call(patches, w, gamma, beta, residual, apply_relu, block_m=256):
    """patches: (M, K) im2col; w: (K, Cout). Returns (M, Cout_padded) f32."""
    m_rows, k_dim = patches.shape
    c_out = w.shape[-1]
    c_pad = _round_up(c_out, 128)                 # lane-dense output channels

    tm = min(block_m, _round_up(m_rows, 8))
    m_pad = _round_up(m_rows, tm)
    n_tiles = m_pad // tm

    # bf16 MXU inputs; zero-padded rows/channels contribute nothing to BN stats.
    patches_p = jnp.pad(patches, ((0, m_pad - m_rows), (0, 0))).astype(jnp.bfloat16)
    w_p = jnp.pad(w, ((0, 0), (0, c_pad - c_out))).astype(jnp.bfloat16)
    g_p = jnp.pad(gamma.astype(jnp.float32), (0, c_pad - c_out)).reshape(1, c_pad)
    b_p = jnp.pad(beta.astype(jnp.float32), (0, c_pad - c_out)).reshape(1, c_pad)

    inputs = [patches_p, w_p, g_p, b_p]
    in_specs = [
        pl.BlockSpec((tm, k_dim), lambda p, m: (m, 0)),        # streamed taps
        pl.BlockSpec((k_dim, c_pad), lambda p, m: (0, 0)),     # resident weights
        pl.BlockSpec((1, c_pad), lambda p, m: (0, 0)),         # resident gamma
        pl.BlockSpec((1, c_pad), lambda p, m: (0, 0)),         # resident beta
    ]
    res_bytes = 0
    if residual is not None:
        res_p = jnp.pad(residual.astype(jnp.float32),
                        ((0, m_pad - m_rows), (0, c_pad - residual.shape[-1])))
        inputs.append(res_p)
        in_specs.append(pl.BlockSpec((tm, c_pad), lambda p, m: (m, 0)))
        res_bytes = res_p.size * 4

    kernel = functools.partial(
        _conv_bn_kernel,
        apply_relu=apply_relu,
        add_residual=residual is not None,
        inv_rows=1.0 / m_rows,
        eps=_EPS,
    )

    cost = pl.CostEstimate(
        flops=4 * m_pad * k_dim * c_pad,          # conv recomputed in both passes
        transcendentals=c_pad,                    # rsqrt
        bytes_accessed=(2 * patches_p.size * 2 + w_p.size * 2
                        + 2 * m_pad * c_pad * 4 + res_bytes + 2 * c_pad * 4),
    )

    out = pl.pallas_call(
        kernel,
        out_shape=jax.ShapeDtypeStruct((m_pad, c_pad), jnp.float32),
        grid=(2, n_tiles),                        # (pass, m_tile)
        in_specs=in_specs,
        out_specs=pl.BlockSpec((tm, c_pad), lambda p, m: (m, 0)),
        scratch_shapes=[pltpu.VMEM((1, c_pad), jnp.float32)] * 4,  # sum, sumsq, scale, shift
        compiler_params=pltpu.CompilerParams(
            # M is the BN-statistics reduction axis -> must stay "arbitrary"
            # (sequential), so it cannot be megacore-parallel even on v7x.
            dimension_semantics=("arbitrary", "arbitrary"),
            vmem_limit_bytes=32 * 1024 * 1024,
        ),
        cost_estimate=cost,
    )(*inputs)
    return out[:m_rows]                           # drop padded rows (channels kept)


# ----------------------------------------------------------------------------
# JAX glue: im2col as a single (M, 9*Cin) matrix (tap axis folded into K).
# ----------------------------------------------------------------------------
def _im2col_3x3(x_nhwc, stride):
    n, h, w, c = x_nhwc.shape
    ho = (h + 2 - 3) // stride + 1
    wo = (w + 2 - 3) // stride + 1
    xp = jnp.pad(x_nhwc, ((0, 0), (1, 1), (1, 1), (0, 0)))
    cols = []
    for di in range(3):
        for dj in range(3):
            t = xp[:, di:di + stride * (ho - 1) + 1:stride,
                      dj:dj + stride * (wo - 1) + 1:stride, :]
            cols.append(t.reshape(n * ho * wo, c))
    return jnp.concatenate(cols, axis=-1), (n, ho, wo)    # (M, 9*C)


def basic_block_forward(x_nchw, params, stride):
    """BasicBlock forward. x_nchw: (N, Cin, H, W). Returns (N, Cmid, Ho, Wo)."""
    x = jnp.transpose(x_nchw, (0, 2, 3, 1))               # NHWC
    n, h, w, c_in = x.shape
    c_mid = params["w1"].shape[-1]

    # conv1 (3x3, stride) + bn1 + relu1
    p1, (_, ho, wo) = _im2col_3x3(x, stride)
    m_rows = n * ho * wo
    y1 = _conv_bn_call(p1, params["w1"].reshape(9 * c_in, c_mid),
                       params["g1"], params["b1"],
                       residual=None, apply_relu=True)[:, :c_mid]

    # residual branch
    if stride != 1:
        x_ds = x[:, :stride * (ho - 1) + 1:stride,
                    :stride * (wo - 1) + 1:stride, :].reshape(m_rows, c_in)
        res = _conv_bn_call(x_ds, params["wd"].reshape(c_in, c_mid),
                            params["gd"], params["bd"],
                            residual=None, apply_relu=False)[:, :c_mid]
    else:
        res = x.reshape(m_rows, c_in)   # identity shortcut (requires Cin == Cmid)

    # conv2 (3x3, stride 1) + bn2 + relu2, then residual add (spec order).
    p2, _ = _im2col_3x3(y1.reshape(n, ho, wo, c_mid), 1)
    out = _conv_bn_call(p2, params["w2"].reshape(9 * c_mid, c_mid),
                        params["g2"], params["b2"],
                        residual=res, apply_relu=True)[:, :c_mid]

    return jnp.transpose(out.reshape(n, ho, wo, c_mid), (0, 3, 1, 2))  # NCHW


# ----------------------------------------------------------------------------
# Pure-JAX reference (bf16 conv inputs + f32 accumulation, same as the kernel).
# ----------------------------------------------------------------------------
def _ref_basic_block(x_nhwc, params, stride):
    def conv(x, w_hwio, s, pad):
        return jax.lax.conv_general_dilated(
            x.astype(jnp.bfloat16), w_hwio.astype(jnp.bfloat16), (s, s), pad,
            dimension_numbers=("NHWC", "HWIO", "NHWC"),
            preferred_element_type=jnp.float32)

    def bn(y, g, b):
        m = jnp.mean(y, axis=(0, 1, 2), keepdims=True)
        v = jnp.mean((y - m) ** 2, axis=(0, 1, 2), keepdims=True)
        return (y - m) * jax.lax.rsqrt(v + _EPS) * g + b

    out = jax.nn.relu(bn(conv(x_nhwc, params["w1"], stride, ((1, 1), (1, 1))),
                         params["g1"], params["b1"]))
    out = jax.nn.relu(bn(conv(out, params["w2"], 1, ((1, 1), (1, 1))),
                         params["g2"], params["b2"]))
    if stride != 1:
        inp = bn(conv(x_nhwc, params["wd"], stride, ((0, 0), (0, 0))),
                 params["gd"], params["bd"])
    else:
        inp = x_nhwc
    return out + inp


# ----------------------------------------------------------------------------
if __name__ == "__main__":
    key = jax.random.PRNGKey(0)
    ks = jax.random.split(key, 10)

    N, H, W = 2, 16, 16
    C_IN, C_MID = 8, 8  # equal so the stride=1 identity shortcut is valid

    x = jax.random.normal(ks[0], (N, C_IN, H, W), jnp.float32)  # NCHW like PyTorch

    params = {
        "w1": 0.1 * jax.random.normal(ks[1], (3, 3, C_IN, C_MID), jnp.float32),
        "g1": 1.0 + 0.1 * jax.random.normal(ks[2], (C_MID,), jnp.float32),
        "b1": 0.1 * jax.random.normal(ks[3], (C_MID,), jnp.float32),
        "w2": 0.1 * jax.random.normal(ks[4], (3, 3, C_MID, C_MID), jnp.float32),
        "g2": 1.0 + 0.1 * jax.random.normal(ks[5], (C_MID,), jnp.float32),
        "b2": 0.1 * jax.random.normal(ks[6], (C_MID,), jnp.float32),
        "wd": 0.1 * jax.random.normal(ks[7], (1, 1, C_IN, C_MID), jnp.float32),
        "gd": 1.0 + 0.1 * jax.random.normal(ks[8], (C_MID,), jnp.float32),
        "bd": 0.1 * jax.random.normal(ks[9], (C_MID,), jnp.float32),
    }

    x_nhwc = jnp.transpose(x, (0, 2, 3, 1))

    for stride in (1, 2):
        out = basic_block_forward(x, params, stride)
        out = jax.block_until_ready(out)

        ref = jnp.transpose(_ref_basic_block(x_nhwc, params, stride),
                            (0, 3, 1, 2))
        assert out.shape == ref.shape, (out.shape, ref.shape)
        err = float(jnp.max(jnp.abs(out - ref)))
        # bf16 MXU inputs (kernel & reference) -> modest tolerance.
        assert err < 2e-2, f"stride={stride}: max abs err {err}"

    print("KERNEL_OK")
</pallas_src>

<mosaic_0001>
module attributes {stable_mosaic.version = 11 : i64} {
  func.func @_conv_bn_kernel(%arg0: i32, %arg1: i32, %arg2: memref<256x72xbf16, #tpu.memory_space<vmem>>, %arg3: memref<72x128xbf16, #tpu.memory_space<vmem>>, %arg4: memref<1x128xf32, #tpu.memory_space<vmem>>, %arg5: memref<1x128xf32, #tpu.memory_space<vmem>>, %arg6: memref<256x128xf32, #tpu.memory_space<vmem>>, %arg7: memref<1x128xf32, #tpu.memory_space<vmem>>, %arg8: memref<1x128xf32, #tpu.memory_space<vmem>>, %arg9: memref<1x128xf32, #tpu.memory_space<vmem>>, %arg10: memref<1x128xf32, #tpu.memory_space<vmem>>) attributes {dimension_semantics = [#tpu.dimension_semantics<arbitrary>, #tpu.dimension_semantics<arbitrary>], iteration_bounds = array<i64: 2, 2>, scalar_prefetch = 0 : i64, scratch_operands = 4 : i64, tpu.core_type = #tpu.core_type<tc>, window_params = [{transform_indices = @transform_0, window_bounds = array<i64: 256, 72>}, {pipeline_mode = #tpu.pipeline_mode<synchronous>, transform_indices = @transform_1, window_bounds = array<i64: 72, 128>}, {pipeline_mode = #tpu.pipeline_mode<synchronous>, transform_indices = @transform_2, window_bounds = array<i64: 1, 128>}, {pipeline_mode = #tpu.pipeline_mode<synchronous>, transform_indices = @transform_3, window_bounds = array<i64: 1, 128>}, {transform_indices = @transform_4, window_bounds = array<i64: 256, 128>}]} {
    %c0 = arith.constant 0 : index
    %c0_0 = arith.constant 0 : index
    %0 = vector.load %arg2[%c0, %c0_0] : memref<256x72xbf16, #tpu.memory_space<vmem>>, vector<256x72xbf16>
    %c0_1 = arith.constant 0 : index
    %c0_2 = arith.constant 0 : index
    %1 = vector.load %arg3[%c0_1, %c0_2] : memref<72x128xbf16, #tpu.memory_space<vmem>>, vector<72x128xbf16>
    %cst = arith.constant dense<0.000000e+00> : vector<256x128xf32>
    %2 = tpu.matmul %0, %1, %cst {dimension_numbers = #tpu.dot_dimension_numbers<[1], [0], [0], [1], [0, 0, 1, 1], [], []>} : vector<256x72xbf16>, vector<72x128xbf16>, vector<256x128xf32> -> vector<256x128xf32>
    %c0_i32 = arith.constant 0 : i32
    %3 = arith.cmpi eq, %arg0, %c0_i32 : i32
    %c0_i32_3 = arith.constant 0 : i32
    %4 = arith.cmpi eq, %arg1, %c0_i32_3 : i32
    %5 = arith.andi %3, %4 : i1
    %6 = arith.extui %5 : i1 to i32
    %c0_i32_4 = arith.constant 0 : i32
    %7 = arith.cmpi ne, %6, %c0_i32_4 : i32
    scf.if %7 {
      %cst_11 = arith.constant 0.000000e+00 : f32
      %19 = vector.broadcast %cst_11 : f32 to vector<1x128xf32>
      %c0_12 = arith.constant 0 : index
      %c0_13 = arith.constant 0 : index
      %20 = vector.load %arg7[%c0_12, %c0_13] : memref<1x128xf32, #tpu.memory_space<vmem>>, vector<1x128xf32>
      tpu.vector_store %arg7[%c0_12, %c0_13], %19 {strides = array<i32>} : memref<1x128xf32, #tpu.memory_space<vmem>>, vector<1x128xf32>,
      %cst_14 = arith.constant 0.000000e+00 : f32
      %21 = vector.broadcast %cst_14 : f32 to vector<1x128xf32>
      %c0_15 = arith.constant 0 : index
      %c0_16 = arith.constant 0 : index
      %22 = vector.load %arg8[%c0_15, %c0_16] : memref<1x128xf32, #tpu.memory_space<vmem>>, vector<1x128xf32>
      tpu.vector_store %arg8[%c0_15, %c0_16], %21 {strides = array<i32>} : memref<1x128xf32, #tpu.memory_space<vmem>>, vector<1x128xf32>,
    } else {
    }
    %c0_i32_5 = arith.constant 0 : i32
    %8 = arith.cmpi eq, %arg0, %c0_i32_5 : i32
    %9 = arith.extui %8 : i1 to i32
    %c0_i32_6 = arith.constant 0 : i32
    %10 = arith.cmpi ne, %9, %c0_i32_6 : i32
    scf.if %10 {
      %c0_11 = arith.constant 0 : index
      %c0_12 = arith.constant 0 : index
      %19 = vector.load %arg7[%c0_11, %c0_12] : memref<1x128xf32, #tpu.memory_space<vmem>>, vector<1x128xf32>
      %cst_13 = arith.constant dense<0.000000e+00> : vector<128xf32>
      %20 = vector.multi_reduction <add>, %2, %cst_13 [0] : vector<256x128xf32> to vector<128xf32>
      %21 = vector.shape_cast %20 : vector<128xf32> to vector<1x128xf32>
      %22 = arith.addf %19, %21 : vector<1x128xf32>
      %c0_14 = arith.constant 0 : index
      %c0_15 = arith.constant 0 : index
      %23 = vector.load %arg7[%c0_14, %c0_15] : memref<1x128xf32, #tpu.memory_space<vmem>>, vector<1x128xf32>
      tpu.vector_store %arg7[%c0_14, %c0_15], %22 {strides = array<i32>} : memref<1x128xf32, #tpu.memory_space<vmem>>, vector<1x128xf32>,
      %c0_16 = arith.constant 0 : index
      %c0_17 = arith.constant 0 : index
      %24 = vector.load %arg8[%c0_16, %c0_17] : memref<1x128xf32, #tpu.memory_space<vmem>>, vector<1x128xf32>
      %25 = arith.mulf %2, %2 : vector<256x128xf32>
      %cst_18 = arith.constant dense<0.000000e+00> : vector<128xf32>
      %26 = vector.multi_reduction <add>, %25, %cst_18 [0] : vector<256x128xf32> to vector<128xf32>
      %27 = vector.shape_cast %26 : vector<128xf32> to vector<1x128xf32>
      %28 = arith.addf %24, %27 : vector<1x128xf32>
      %c0_19 = arith.constant 0 : index
      %c0_20 = arith.constant 0 : index
      %29 = vector.load %arg8[%c0_19, %c0_20] : memref<1x128xf32, #tpu.memory_space<vmem>>, vector<1x128xf32>
      tpu.vector_store %arg8[%c0_19, %c0_20], %28 {strides = array<i32>} : memref<1x128xf32, #tpu.memory_space<vmem>>, vector<1x128xf32>,
      %cst_21 = arith.constant 0.000000e+00 : f32
      %30 = vector.broadcast %cst_21 : f32 to vector<256x128xf32>
      %c0_22 = arith.constant 0 : index
      %c0_23 = arith.constant 0 : index
      %31 = vector.load %arg6[%c0_22, %c0_23] : memref<256x128xf32, #tpu.memory_space<vmem>>, vector<256x128xf32>
      tpu.vector_store %arg6[%c0_22, %c0_23], %30 {strides = array<i32>} : memref<256x128xf32, #tpu.memory_space<vmem>>, vector<256x128xf32>,
    } else {
    }
    %c1_i32 = arith.constant 1 : i32
    %11 = arith.cmpi eq, %arg0, %c1_i32 : i32
    %c0_i32_7 = arith.constant 0 : i32
    %12 = arith.cmpi eq, %arg1, %c0_i32_7 : i32
    %13 = arith.andi %11, %12 : i1
    %14 = arith.extui %13 : i1 to i32
    %c0_i32_8 = arith.constant 0 : i32
    %15 = arith.cmpi ne, %14, %c0_i32_8 : i32
    scf.if %15 {
      %c0_11 = arith.constant 0 : index
      %c0_12 = arith.constant 0 : index
      %19 = vector.load %arg7[%c0_11, %c0_12] : memref<1x128xf32, #tpu.memory_space<vmem>>, vector<1x128xf32>
      %cst_13 = arith.constant 0.001953125 : f32
      %20 = vector.broadcast %cst_13 : f32 to vector<1x128xf32>
      %21 = arith.mulf %19, %20 : vector<1x128xf32>
      %c0_14 = arith.constant 0 : index
      %c0_15 = arith.constant 0 : index
      %22 = vector.load %arg8[%c0_14, %c0_15] : memref<1x128xf32, #tpu.memory_space<vmem>>, vector<1x128xf32>
      %cst_16 = arith.constant 0.001953125 : f32
      %23 = vector.broadcast %cst_16 : f32 to vector<1x128xf32>
      %24 = arith.mulf %22, %23 : vector<1x128xf32>
      %25 = arith.mulf %21, %21 : vector<1x128xf32>
      %26 = arith.subf %24, %25 : vector<1x128xf32>
      %cst_17 = arith.constant 0.000000e+00 : f32
      %27 = vector.broadcast %cst_17 : f32 to vector<1x128xf32>
      %28 = arith.maximumf %26, %27 : vector<1x128xf32>
      %cst_18 = arith.constant 9.99999974E-6 : f32
      %29 = vector.broadcast %cst_18 : f32 to vector<1x128xf32>
      %30 = arith.addf %28, %29 : vector<1x128xf32>
      %31 = math.rsqrt %30 : vector<1x128xf32>
      %c0_19 = arith.constant 0 : index
      %c0_20 = arith.constant 0 : index
      %32 = vector.load %arg4[%c0_19, %c0_20] : memref<1x128xf32, #tpu.memory_space<vmem>>, vector<1x128xf32>
      %33 = arith.mulf %32, %31 : vector<1x128xf32>
      %c0_21 = arith.constant 0 : index
      %c0_22 = arith.constant 0 : index
      %34 = vector.load %arg9[%c0_21, %c0_22] : memref<1x128xf32, #tpu.memory_space<vmem>>, vector<1x128xf32>
      tpu.vector_store %arg9[%c0_21, %c0_22], %33 {strides = array<i32>} : memref<1x128xf32, #tpu.memory_space<vmem>>, vector<1x128xf32>,
      %c0_23 = arith.constant 0 : index
      %c0_24 = arith.constant 0 : index
      %35 = vector.load %arg5[%c0_23, %c0_24] : memref<1x128xf32, #tpu.memory_space<vmem>>, vector<1x128xf32>
      %36 = arith.mulf %21, %33 : vector<1x128xf32>
      %37 = arith.subf %35, %36 : vector<1x128xf32>
      %c0_25 = arith.constant 0 : index
      %c0_26 = arith.constant 0 : index
      %38 = vector.load %arg10[%c0_25, %c0_26] : memref<1x128xf32, #tpu.memory_space<vmem>>, vector<1x128xf32>
      tpu.vector_store %arg10[%c0_25, %c0_26], %37 {strides = array<i32>} : memref<1x128xf32, #tpu.memory_space<vmem>>, vector<1x128xf32>,
    } else {
    }
    %c1_i32_9 = arith.constant 1 : i32
    %16 = arith.cmpi eq, %arg0, %c1_i32_9 : i32
    %17 = arith.extui %16 : i1 to i32
    %c0_i32_10 = arith.constant 0 : i32
    %18 = arith.cmpi ne, %17, %c0_i32_10 : i32
    scf.if %18 {
      %c0_11 = arith.constant 0 : index
      %c0_12 = arith.constant 0 : index
      %19 = vector.load %arg9[%c0_11, %c0_12] : memref<1x128xf32, #tpu.memory_space<vmem>>, vector<1x128xf32>
      %20 = vector.broadcast %19 : vector<1x128xf32> to vector<256x128xf32>
      %21 = arith.mulf %2, %20 : vector<256x128xf32>
      %c0_13 = arith.constant 0 : index
      %c0_14 = arith.constant 0 : index
      %22 = vector.load %arg10[%c0_13, %c0_14] : memref<1x128xf32, #tpu.memory_space<vmem>>, vector<1x128xf32>
      %23 = vector.broadcast %22 : vector<1x128xf32> to vector<256x128xf32>
      %24 = arith.addf %21, %23 : vector<256x128xf32>
      %cst_15 = arith.constant 0.000000e+00 : f32
      %25 = vector.broadcast %cst_15 : f32 to vector<256x128xf32>
      %26 = arith.maximumf %24, %25 : vector<256x128xf32>
      %c0_16 = arith.constant 0 : index
      %c0_17 = arith.constant 0 : index
      %27 = vector.load %arg6[%c0_16, %c0_17] : memref<256x128xf32, #tpu.memory_space<vmem>>, vector<256x128xf32>
      tpu.vector_store %arg6[%c0_16, %c0_17], %26 {strides = array<i32>} : memref<256x128xf32, #tpu.memory_space<vmem>>, vector<256x128xf32>,
    } else {
    }
    return
  }
  func.func @transform_0(%arg0: i32, %arg1: i32) -> (i32, i32) {
    %c0_i32 = arith.constant 0 : i32
    %c0_i32_0 = arith.constant 0 : i32
    return %arg1, %c0_i32 : i32, i32
  }
  func.func @transform_1(%arg0: i32, %arg1: i32) -> (i32, i32) {
    %c0_i32 = arith.constant 0 : i32
    %c0_i32_0 = arith.constant 0 : i32
    %c0_i32_1 = arith.constant 0 : i32
    return %c0_i32, %c0_i32_0 : i32, i32
  }
  func.func @transform_2(%arg0: i32, %arg1: i32) -> (i32, i32) {
    %c0_i32 = arith.constant 0 : i32
    %c0_i32_0 = arith.constant 0 : i32
    %c0_i32_1 = arith.constant 0 : i32
    return %c0_i32, %c0_i32_0 : i32, i32
  }
  func.func @transform_3(%arg0: i32, %arg1: i32) -> (i32, i32) {
    %c0_i32 = arith.constant 0 : i32
    %c0_i32_0 = arith.constant 0 : i32
    %c0_i32_1 = arith.constant 0 : i32
    return %c0_i32, %c0_i32_0 : i32, i32
  }
  func.func @transform_4(%arg0: i32, %arg1: i32) -> (i32, i32) {
    %c0_i32 = arith.constant 0 : i32
    %c0_i32_0 = arith.constant 0 : i32
    return %arg1, %c0_i32 : i32, i32
  }
}

</mosaic_0001>

<bundles_post_ra>
// kernel: tpu_custom_call.1
= control target key start
LH: loop header
LB: loop body
LE: loop exit
PB: predicated region body
PF: predicated region fallthrough
CT: control target
= control target key end

     0   :  { %9 = vsyncpa [#allocation7], 0  ;;  %s1874_s0 = inlined_call_operand.vmem [shape: bf16[512,72], index: 0, kind: input, shape index: {}]   ;;  %s1875_s1 = inlined_call_operand.vmem [shape: bf16[72,128], index: 1, kind: input, shape index: {}]   ;;  %s1876_s2 = inlined_call_operand.vmem [shape: f32[1,128], index: 2, kind: input, shape index: {}]   ;;  %s1877_s3 = inlined_call_operand.vmem [shape: f32[1,128], index: 3, kind: input, shape index: {}]   ;;  %s1878_s4 = inlined_call_operand.hbm [shape: f32[512,128], index: 4, kind: output, shape index: {}]  }
   0x1   :  { %11 = vsyncpa [#allocation7 + $0x1], 0  ;;  %s1336_s15 = smov 0   ;;  %s1338_s16 = smov 0  }
   0x2   :  { %s1340_s17 = smov 0   ;;  %s1342_s18 = smov 0  }
   0x3   :  { %s1344_s19 = smov 0   ;;  %s1346_s20 = smov 0  }
   0x4   :  { %s1348_s21 = smov 0   ;;  %s1350_s22 = smov 0  }
   0x5 LB: > { %s982_s23 = sadd.s32 4294967295, %s1304_s22   ;;  %s983_s24 = sadd.s32 4294967294, %s1304_s22   ;;  %s1304_s22 = sphi %s1350_s22, %s17_s22   ;;  %s1300_s21 = sphi %s1348_s21, %s1888_s21   ;;  %s1296_s20 = sphi %s1346_s20, %s1887_s20   ;;  %s1292_s19 = sphi %s1344_s19, %s1886_s19   ;;  %s1288_s18 = sphi %s1342_s18, %s1885_s18   ;;  %s1284_s17 = sphi %s1340_s17, %s1884_s17   ;;  %s1280_s16 = sphi %s1338_s16, %s1883_s16   ;;  %s1276_s15 = sphi %s1336_s15, %s1882_s15  }
   0x6   : > { %s26_s25 = sadd.s32 1, %s1296_s20  ;;  %s29_s26 = sadd.s32 1, %s1300_s21 }
   0x7   : > { %p27_p0 = scmp.ge.s32.totalorder %s26_s25, 2  ;;  %s125_s27 = sadd.s32 1, %s1284_s17 }
   0x8   : > { %p135_p1 = scmp.ne.s32.totalorder %s1284_s17, %s1280_s16  ;;  %p136_p2 = scmp.eq.s32.totalorder %s982_s23, 3 }
   0x9   : > { %s1890_s25 = smov (%p27_p0, %s26_s25), 0  ;;  %s1892_s26 = smov (!%p27_p0, %s29_s26), %s1300_s21 }
   0xa   : > { %s122_s28 = ssub.s32 %s1296_s20, %s1890_s25  ;;  %p1388_p3 = por %p136_p2, %p135_p1 }
   0xb   : > { %p31_p4 = scmp.ge.s32.totalorder %s1892_s26, 2  ;;  %p123_p5 = scmp.eq.s32.totalorder %s122_s28, 0 }
   0xc   : > { %p141_p6 = scmp.ne.s32.totalorder %s1280_s16, %s1276_s15  ;;  %p142_p7 = scmp.eq.s32.totalorder %s983_s24, 3 }
   0xd   : > { %s1894_s26 = smov (%p31_p4, %s1892_s26), 0  ;;  %p986_p9 = scmp.ge.s32.totalorder %s1304_s22, 1 }
   0xe   : > { %s1397_s30 = scalar_select %p123_p5, %s1284_s17, %s125_s27  }
   0xf   : > { %p1399_p8 = por %p142_p7, %p141_p6  ;;  %p178_p10 = scmp.lt.s32.totalorder %s1304_s22, 5 }
  0x11   : > { %p179_p11 = pnand %p986_p9, %p178_p10 }
  0x12   : > { %s201_s6 = sand.u32 (!%p179_p11), 1, %s1280_s16   ;;  %v1187_v0 = vld [vmem:[%s1875_s1] sm:$0xff] (!%p179_p11)   ;;  %v1188_v1 = vld [vmem:[%s1875_s1 + $0x8] sm:$0xff] (!%p179_p11)   ;;  %v1189_v2 = vld [vmem:[%s1875_s1 + $0x10] sm:$0xff] (!%p179_p11)   ;;  %s988_s14 = sshll.u32 (!%p179_p11), %s1288_s18, 5  ;;  %vm360_vm0 = vcmask (!%p179_p11), 588800  }
  0x13   : > { %182 = sbr.rel (%p179_p11) target bundleno = 449 (0x1c1), region = 36  ;;  %s1411_s9 = sshll.u32 (!%p179_p11), %s201_s6, 8  ;;  %1058 = vmatprep.subr.bf16.mxu0 (!%p179_p11), %v1187_v0  ;;  %1100 = vmatprep.subr.bf16.mxu1 (!%p179_p11), %v1187_v0  ;;  %v1190_v3 = vld [vmem:[%s1875_s1 + $0x18] sm:$0xff] (!%p179_p11)   ;;  %v1191_v4 = vld [vmem:[%s1875_s1 + $0x20] ss:$0 sps:$4 sm:$0xff] (!%p179_p11)   ;;  %vm409_vm1 = vcmask (!%p179_p11), 1043456  }
  0x14   : > { %1059 = vmatpush3.bf16.msra.mxu0 (!%p179_p11), %v1187_v0  ;;  %1105 = vmatpush3.bf16.msra.mxu1 (!%p179_p11), %v1187_v0  ;;  %p205_p12 = scmp.lt.s32.totalorder (!%p179_p11), %s988_s14, 63  ;;  %v411_v7 = vsel (!%p179_p11), %vm409_vm1, %v1191_v4, 0  ;;  %p574_p13 = scmp.eq.s32.totalorder (!%p179_p11), %s1292_s19, 0 }
  0x15   : > { %1060 = vmatprep.subr.bf16.mxu0 (!%p179_p11), %v1188_v1  ;;  %1101 = vmatprep.subr.bf16.mxu1 (!%p179_p11), %v1188_v1  ;;  %p575_p0 = scmp.eq.s32.totalorder (!%p179_p11), %s1288_s18, 0  ;;  %s1536_s13 = scalar_lea.vmem (!%p179_p11), [#allocation6], %s1411_s9 }
  0x17   : > { %p1467_p1 = pnand (!%p179_p11), %p575_p0, %p574_p13 }
  0x18   : > { %1061 = vmatpush3.bf16.msra.mxu0 (!%p179_p11), %v1188_v1  ;;  %1106 = vmatpush3.bf16.msra.mxu1 (!%p179_p11), %v1188_v1 }
  0x19   : > { %1062 = vmatprep.subr.bf16.mxu0 (!%p179_p11), %v1189_v2  ;;  %1102 = vmatprep.subr.bf16.mxu1 (!%p179_p11), %v1189_v2 }
  0x1a   : > { %s1896_s14 = smov (!%p205_p12, %s988_s14), 63  ;;  %v1306_v54 = vmov (!%p1467_p1), 0.0  }
  0x1b   : > { %s989_s27 = sshll.u32 %s1896_s14, 2  ;;  %580 = vst [vmem:[#allocation2] sm:$0x1] (!%p1467_p1), %v1306_v54  ;;  %581 = vst [vmem:[#allocation3] sm:$0x1] (!%p1467_p1), %v1306_v54 }
  0x1c   : > { %s1429_s11 = scalar_lea.vmem %s1874_s0, %s989_s27  ;;  %1063 = vmatpush3.bf16.msra.mxu0 %v1189_v2  ;;  %1107 = vmatpush3.bf16.msra.mxu1 %v1189_v2 }
  0x1d   : > { %v1192_v5 = vld [vmem:[%s1429_s11] sm:$0xff]   ;;  %1064 = vmatprep.subr.bf16.mxu0 %v1190_v3  ;;  %1103 = vmatprep.subr.bf16.mxu1 %v1190_v3  ;;  %v1194_v8 = vld [vmem:[%s1429_s11 + $0x8] sm:$0xff]   ;;  %v1196_v10 = vld [vmem:[%s1429_s11 + $0x10] sm:$0xff]  }
  0x1e   : > { %v1193_v6 = vld [vmem:[%s1429_s11 + $0x40] sm:$0xff]   ;;  %1068 = vmatprep.mubr.msk.bf16.mxu0 %vm360_vm0, %v1192_v5  ;;  %v1195_v9 = vld [vmem:[%s1429_s11 + $0x48] sm:$0xff]   ;;  %v1197_v11 = vld [vmem:[%s1429_s11 + $0x50] sm:$0xff]  }
  0x1f   : > { %1084 = vmatprep.mubr.msk.bf16.mxu1 %vm360_vm0, %v1193_v6  ;;  %v1198_v12 = vld [vmem:[%s1429_s11 + $0x18] sm:$0xff]   ;;  %v1200_v14 = vld [vmem:[%s1429_s11 + $0x20] sm:$0xff]   ;;  %v1202_v16 = vld [vmem:[%s1429_s11 + $0x28] sm:$0xff]  }
  0x20   : > { %1065 = vmatpush3.bf16.msra.mxu0 %v1190_v3  ;;  %1108 = vmatpush3.bf16.msra.mxu1 %v1190_v3  ;;  %v1199_v13 = vld [vmem:[%s1429_s11 + $0x58] sm:$0xff]   ;;  %v1201_v15 = vld [vmem:[%s1429_s11 + $0x60] sm:$0xff]   ;;  %v1203_v17 = vld [vmem:[%s1429_s11 + $0x68] sm:$0xff]  }
  0x21   : > { %1110 = vmatprep.subr.msk.bf16.mxu0 %vm409_vm1, %v1191_v4  ;;  %1111 = vmatprep.subr.msk.bf16.mxu1 %vm409_vm1, %v1191_v4  ;;  %v1204_v18 = vld [vmem:[%s1429_s11 + $0x30] sm:$0xff]   ;;  %v1206_v20 = vld [vmem:[%s1429_s11 + $0x38] sm:$0xff]  }
  0x22   : > { %v1205_v19 = vld [vmem:[%s1429_s11 + $0x70] sm:$0xff]   ;;  %v1207_v21 = vld [vmem:[%s1429_s11 + $0x78] sm:$0xff]  }
  0x24   : > { %1067 = vmatpush3.bf16.msra.mxu0 %v411_v7  ;;  %1109 = vmatpush3.bf16.msra.mxu1 %v411_v7 }
  0x27   : > { %1069 = vmatmul.mubr.msk.bf16.vlgmr.msra.gmra.mrb[0].mxu0 %vm360_vm0, %v1194_v8  ;;  %1085 = vmatmul.mubr.msk.bf16.vlgmr.msra.gmra.mrb[0].mxu1 %vm360_vm0, %v1195_v9 }
  0x28   : > { %1072 = vmatprep.mubr.msk.bf16.mxu0 %vm360_vm0, %v1196_v10  ;;  %1088 = vmatprep.mubr.msk.bf16.mxu1 %vm360_vm0, %v1197_v11 }
  0x2f   : > { %1073 = vmatmul.mubr.msk.bf16.gmra.mrb[4].mxu0 %vm360_vm0, %v1198_v12  ;;  %1089 = vmatmul.mubr.msk.bf16.gmra.mrb[4].mxu1 %vm360_vm0, %v1199_v13 }
  0x30   : > { %1076 = vmatprep.mubr.msk.bf16.mxu0 %vm360_vm0, %v1200_v14  ;;  %1092 = vmatprep.mubr.msk.bf16.mxu1 %vm360_vm0, %v1201_v15 }
  0x37   : > { %1077 = vmatmul.mubr.msk.bf16.gmra.mrb[8].mxu0 %vm360_vm0, %v1202_v16  ;;  %1093 = vmatmul.mubr.msk.bf16.gmra.mrb[8].mxu1 %vm360_vm0, %v1203_v17 }
  0x38   : > { %1080 = vmatprep.mubr.msk.bf16.mxu0 %vm360_vm0, %v1204_v18  ;;  %1096 = vmatprep.mubr.msk.bf16.mxu1 %vm360_vm0, %v1205_v19 }
  0x3f   : > { %1081 = vmatmul.mubr.msk.bf16.gmra.mrb[12].mxu0 %vm360_vm0, %v1206_v20  ;;  %1097 = vmatmul.mubr.msk.bf16.gmra.mrb[12].mxu1 %vm360_vm0, %v1207_v21 }
  0xfa   : > { %v1471_v22 = vpop.f32.mrb[0].mxu0  ;;  %v1473_v23 = vpop.f32.mrb[0].mxu1 }
  0xfb   : > { %v1475_v24 = vpop.f32.mrb[1].mxu0  ;;  %v1477_v25 = vpop.f32.mrb[1].mxu1 }
  0xfc   : > { %v1479_v26 = vpop.f32.mrb[2].mxu0  ;;  %v1481_v27 = vpop.f32.mrb[2].mxu1 }
  0xfd   : > { %v1483_v28 = vpop.f32.mrb[3].mxu0  ;;  %v1485_v29 = vpop.f32.mrb[3].mxu1 }
 0x102   : > { %v1487_v30 = vpop.f32.mrb[4].mxu0  ;;  %v1489_v31 = vpop.f32.mrb[4].mxu1 }
 0x103   : > { %v1491_v32 = vpop.f32.mrb[5].mxu0  ;;  %v1493_v33 = vpop.f32.mrb[5].mxu1 }
 0x104   : > { %v1495_v34 = vpop.f32.mrb[6].mxu0  ;;  %v1497_v35 = vpop.f32.mrb[6].mxu1 }
 0x105   : > { %v1499_v36 = vpop.f32.mrb[7].mxu0  ;;  %v1501_v37 = vpop.f32.mrb[7].mxu1 }
 0x10a   : > { %v1503_v38 = vpop.f32.mrb[8].mxu0  ;;  %v1505_v39 = vpop.f32.mrb[8].mxu1 }
 0x10b   : > { %v1507_v40 = vpop.f32.mrb[9].mxu0  ;;  %v1509_v41 = vpop.f32.mrb[9].mxu1 }
 0x10c   : > { %v1511_v42 = vpop.f32.mrb[10].mxu0  ;;  %v1513_v43 = vpop.f32.mrb[10].mxu1 }
 0x10d   : > { %v1515_v44 = vpop.f32.mrb[11].mxu0  ;;  %v1517_v45 = vpop.f32.mrb[11].mxu1 }
 0x10f   : > { %579 = sbr.rel (%p1467_p1) target bundleno = 278 (0x116), region = 40 }
 0x112   : > { %v1519_v46 = vpop.f32.mrb[12].mxu0  ;;  %v1521_v47 = vpop.f32.mrb[12].mxu1 }
 0x113   : > { %v1523_v48 = vpop.f32.mrb[13].mxu0  ;;  %v1525_v49 = vpop.f32.mrb[13].mxu1 }
 0x114   : > { %v1527_v50 = vpop.f32.mrb[14].mxu0  ;;  %v1529_v51 = vpop.f32.mrb[14].mxu1 }
 0x115   : > { %v1531_v52 = vpop.f32.mrb[15].mxu0  ;;  %v1533_v53 = vpop.f32.mrb[15].mxu1 }
 0x116 PF: > { %p1027_p2 = scmp.ne.s32.totalorder %s1292_s19, 0 }
 0x117   : > { %v586_v55 = vadd.f32 (!%p1027_p2), %v1483_v28, %v1475_v24  ;;  %v626_v58 = vmul.f32 (!%p1027_p2), %v1475_v24, %v1475_v24  ;;  %v627_v59 = vmul.f32 (!%p1027_p2), %v1483_v28, %v1483_v28  ;;  %v628_v61 = vmul.f32 (!%p1027_p2), %v1471_v22, %v1471_v22 }
 0x118   : > { %584 = sbr.rel (%p1027_p2) target bundleno = 358 (0x166), region = 44  ;;  %v629_v63 = vmul.f32 (!%p1027_p2), %v1479_v26, %v1479_v26  ;;  %v1307_v2 = vmov (!%p1027_p2), 0.0   ;;  %v630_v3 = vmul.f32 (!%p1027_p2), %v1491_v32, %v1491_v32  ;;  %v631_v6 = vmul.f32 (!%p1027_p2), %v1499_v36, %v1499_v36 }
 0x119   : > { %v587_v56 = vadd.f32 (!%p1027_p2), %v1471_v22, %v586_v55  ;;  %v658_v0 = vadd.f32 (!%p1027_p2), %v627_v59, %v626_v58  ;;  %697 = vst [vmem:[%s1536_s13] sm:$0xff] (!%p1027_p2), %v1307_v2  ;;  %698 = vst [vmem:[%s1536_s13 + $0x8] sm:$0xff] (!%p1027_p2), %v1307_v2  ;;  %v632_v9 = vmul.f32 (!%p1027_p2), %v1487_v30, %v1487_v30 }
 0x11a   : > { %699 = vst [vmem:[%s1536_s13 + $0x10] sm:$0xff] (!%p1027_p2), %v1307_v2  ;;  %700 = vst [vmem:[%s1536_s13 + $0x18] sm:$0xff] (!%p1027_p2), %v1307_v2  ;;  %v633_v12 = vmul.f32 (!%p1027_p2), %v1495_v34, %v1495_v34  ;;  %v634_v15 = vmul.f32 (!%p1027_p2), %v1507_v40, %v1507_v40  ;;  %v635_v18 = vmul.f32 (!%p1027_p2), %v1515_v44, %v1515_v44 }
 0x11b   : > { %v588_v57 = vadd.f32 (!%p1027_p2), %v1479_v26, %v587_v56  ;;  %701 = vst [vmem:[%s1536_s13 + $0x20] sm:$0xff] (!%p1027_p2), %v1307_v2  ;;  %702 = vst [vmem:[%s1536_s13 + $0x28] sm:$0xff] (!%p1027_p2), %v1307_v2  ;;  %v659_v4 = vadd.f32 (!%p1027_p2), %v658_v0, %v628_v61  ;;  %v636_v21 = vmul.f32 (!%p1027_p2), %v1503_v38, %v1503_v38 }
 0x11c   : > { %703 = vst [vmem:[%s1536_s13 + $0x30] sm:$0xff] (!%p1027_p2), %v1307_v2  ;;  %704 = vst [vmem:[%s1536_s13 + $0x38] sm:$0xff] (!%p1027_p2), %v1307_v2  ;;  %v637_v56 = vmul.f32 (!%p1027_p2), %v1511_v42, %v1511_v42  ;;  %v638_v59 = vmul.f32 (!%p1027_p2), %v1523_v48, %v1523_v48 }
 0x11d   : > { %v589_v60 = vadd.f32 (!%p1027_p2), %v588_v57, %v1491_v32  ;;  %705 = vst [vmem:[%s1536_s13 + $0x40] sm:$0xff] (!%p1027_p2), %v1307_v2  ;;  %706 = vst [vmem:[%s1536_s13 + $0x48] sm:$0xff] (!%p1027_p2), %v1307_v2  ;;  %v660_v7 = vadd.f32 (!%p1027_p2), %v659_v4, %v629_v63  ;;  %v641_v4 = vmul.f32 (!%p1027_p2), %v1527_v50, %v1527_v50 }
 0x11e   : > { %707 = vst [vmem:[%s1536_s13 + $0x50] sm:$0xff] (!%p1027_p2), %v1307_v2  ;;  %708 = vst [vmem:[%s1536_s13 + $0x58] sm:$0xff] (!%p1027_p2), %v1307_v2 }
 0x11f   : > { %v590_v62 = vadd.f32 %v589_v60, %v1499_v36  ;;  %709 = vst [vmem:[%s1536_s13 + $0x60] sm:$0xff] %v1307_v2  ;;  %710 = vst [vmem:[%s1536_s13 + $0x68] sm:$0xff] %v1307_v2  ;;  %v661_v10 = vadd.f32 %v660_v7, %v630_v3  ;;  %v642_v7 = vmul.f32 %v1477_v25, %v1477_v25 }
 0x120   : > { %711 = vst [vmem:[%s1536_s13 + $0x70] sm:$0xff] %v1307_v2  ;;  %712 = vst [vmem:[%s1536_s13 + $0x78] sm:$0xff] %v1307_v2 }
 0x121   : > { %v591_v1 = vadd.f32 %v1487_v30, %v590_v62  ;;  %713 = vst [vmem:[%s1536_s13 + $0x80] sm:$0xff] %v1307_v2  ;;  %714 = vst [vmem:[%s1536_s13 + $0x88] sm:$0xff] %v1307_v2  ;;  %v662_v13 = vadd.f32 %v661_v10, %v631_v6  ;;  %v639_v62 = vmul.f32 %v1531_v52, %v1531_v52 }
 0x122   : > { %715 = vst [vmem:[%s1536_s13 + $0x90] sm:$0xff] %v1307_v2  ;;  %716 = vst [vmem:[%s1536_s13 + $0x98] sm:$0xff] %v1307_v2  ;;  %v643_v10 = vmul.f32 %v1485_v29, %v1485_v29 }
 0x123   : > { %717 = vst [vmem:[%s1536_s13 + $0xa0] sm:$0xff] %v1307_v2  ;;  %718 = vst [vmem:[%s1536_s13 + $0xa8] sm:$0xff] %v1307_v2  ;;  %v592_v5 = vadd.f32 %v1495_v34, %v591_v1  ;;  %v663_v16 = vadd.f32 %v662_v13, %v632_v9  ;;  %v640_v1 = vmul.f32 %v1519_v46, %v1519_v46 }
 0x124   : > { %719 = vst [vmem:[%s1536_s13 + $0xb0] sm:$0xff] %v1307_v2  ;;  %720 = vst [vmem:[%s1536_s13 + $0xb8] sm:$0xff] %v1307_v2  ;;  %v644_v13 = vmul.f32 %v1473_v23, %v1473_v23 }
 0x125   : > { %721 = vst [vmem:[%s1536_s13 + $0xc0] sm:$0xff] %v1307_v2  ;;  %722 = vst [vmem:[%s1536_s13 + $0xc8] sm:$0xff] %v1307_v2  ;;  %v593_v8 = vadd.f32 %v592_v5, %v1507_v40  ;;  %v664_v19 = vadd.f32 %v663_v16, %v633_v12  ;;  %v645_v16 = vmul.f32 %v1481_v27, %v1481_v27 }
 0x126   : > { %723 = vst [vmem:[%s1536_s13 + $0xd0] sm:$0xff] %v1307_v2  ;;  %724 = vst [vmem:[%s1536_s13 + $0xd8] sm:$0xff] %v1307_v2 }
 0x127   : > { %725 = vst [vmem:[%s1536_s13 + $0xe0] sm:$0xff] %v1307_v2  ;;  %726 = vst [vmem:[%s1536_s13 + $0xe8] sm:$0xff] %v1307_v2  ;;  %v594_v11 = vadd.f32 %v593_v8, %v1515_v44  ;;  %v665_v54 = vadd.f32 %v664_v19, %v634_v15  ;;  %v646_v19 = vmul.f32 %v1493_v33, %v1493_v33 }
 0x128   : > { %727 = vst [vmem:[%s1536_s13 + $0xf0] sm:$0xff] %v1307_v2  ;;  %728 = vst [vmem:[%s1536_s13 + $0xf8] sm:$0xff] %v1307_v2 }
 0x129   : > { %v595_v14 = vadd.f32 %v1503_v38, %v594_v11  ;;  %v666_v57 = vadd.f32 %v665_v54, %v635_v18  ;;  %v647_v54 = vmul.f32 %v1501_v37, %v1501_v37 }
 0x12b   : > { %v596_v17 = vadd.f32 %v1511_v42, %v595_v14  ;;  %v667_v60 = vadd.f32 %v666_v57, %v636_v21  ;;  %v648_v57 = vmul.f32 %v1489_v31, %v1489_v31 }
 0x12d   : > { %v597_v20 = vadd.f32 %v596_v17, %v1523_v48  ;;  %v668_v63 = vadd.f32 %v667_v60, %v637_v56  ;;  %v649_v60 = vmul.f32 %v1497_v35, %v1497_v35 }
 0x12f   : > { %v598_v55 = vadd.f32 %v597_v20, %v1531_v52  ;;  %v669_v2 = vadd.f32 %v668_v63, %v638_v59  ;;  %v650_v63 = vmul.f32 %v1509_v41, %v1509_v41 }
 0x131   : > { %v599_v58 = vadd.f32 %v1519_v46, %v598_v55  ;;  %v670_v5 = vadd.f32 %v669_v2, %v639_v62  ;;  %v651_v2 = vmul.f32 %v1517_v45, %v1517_v45 }
 0x133   : > { %v600_v61 = vadd.f32 %v1527_v50, %v599_v58  ;;  %v671_v8 = vadd.f32 %v670_v5, %v640_v1  ;;  %v652_v5 = vmul.f32 %v1505_v39, %v1505_v39 }
 0x135   : > { %v601_v0 = vadd.f32 %v600_v61, %v1477_v25  ;;  %v672_v11 = vadd.f32 %v671_v8, %v641_v4  ;;  %v653_v8 = vmul.f32 %v1513_v43, %v1513_v43 }
 0x137   : > { %v602_v3 = vadd.f32 %v601_v0, %v1485_v29  ;;  %v673_v14 = vadd.f32 %v672_v11, %v642_v7  ;;  %v654_v11 = vmul.f32 %v1525_v49, %v1525_v49 }
 0x139   : > { %v603_v6 = vadd.f32 %v1473_v23, %v602_v3  ;;  %v674_v17 = vadd.f32 %v673_v14, %v643_v10  ;;  %v655_v14 = vmul.f32 %v1533_v53, %v1533_v53 }
 0x13b   : > { %v604_v9 = vadd.f32 %v1481_v27, %v603_v6  ;;  %v675_v20 = vadd.f32 %v674_v17, %v644_v13  ;;  %v656_v17 = vmul.f32 %v1521_v47, %v1521_v47 }
 0x13d   : > { %v605_v12 = vadd.f32 %v604_v9, %v1493_v33  ;;  %v676_v55 = vadd.f32 %v675_v20, %v645_v16  ;;  %v657_v20 = vmul.f32 %v1529_v51, %v1529_v51 }
 0x13f   : > { %v606_v15 = vadd.f32 %v605_v12, %v1501_v37  ;;  %v677_v58 = vadd.f32 %v676_v55, %v646_v19 }
 0x141   : > { %v607_v18 = vadd.f32 %v1489_v31, %v606_v15  ;;  %v678_v61 = vadd.f32 %v677_v58, %v647_v54 }
 0x143   : > { %v608_v21 = vadd.f32 %v1497_v35, %v607_v18  ;;  %v679_v0 = vadd.f32 %v678_v61, %v648_v57 }
 0x145   : > { %v609_v56 = vadd.f32 %v608_v21, %v1509_v41  ;;  %v680_v3 = vadd.f32 %v679_v0, %v649_v60 }
 0x147   : > { %v610_v59 = vadd.f32 %v609_v56, %v1517_v45  ;;  %v681_v6 = vadd.f32 %v680_v3, %v650_v63  ;;  %v625_v3 = vld [vmem:[#allocation3] sm:$0x1] }
 0x149   : > { %v611_v62 = vadd.f32 %v1505_v39, %v610_v59  ;;  %v682_v9 = vadd.f32 %v681_v6, %v651_v2  ;;  %v585_v59 = vld [vmem:[#allocation2] sm:$0x1] }
 0x14b   : > { %v612_v1 = vadd.f32 %v1513_v43, %v611_v62  ;;  %v683_v12 = vadd.f32 %v682_v9, %v652_v5 }
 0x14d   : > { %v613_v4 = vadd.f32 %v612_v1, %v1525_v49  ;;  %v684_v15 = vadd.f32 %v683_v12, %v653_v8 }
 0x14f   : > { %v614_v7 = vadd.f32 %v613_v4, %v1533_v53  ;;  %v685_v18 = vadd.f32 %v684_v15, %v654_v11 }
 0x151   : > { %v615_v10 = vadd.f32 %v1521_v47, %v614_v7  ;;  %v686_v21 = vadd.f32 %v685_v18, %v655_v14 }
 0x153   : > { %v616_v13 = vadd.f32 %v1529_v51, %v615_v10  ;;  %v687_v55 = vadd.f32 %v686_v21, %v656_v17 }
 0x155   : > { %v617_v16 = vrot.slane %v616_v13, 4  ;;  %v688_v57 = vadd.f32 %v687_v55, %v657_v20 }
 0x157   : > { %v618_v19 = vadd.f32 %v617_v16, %v616_v13  ;;  %v689_v60 = vrot.slane %v688_v57, 4 }
 0x159   : > { %v619_v54 = vrot.slane %v618_v19, 2  ;;  %v690_v62 = vadd.f32 %v689_v60, %v688_v57 }
 0x15b   : > { %v620_v56 = vadd.f32 %v619_v54, %v618_v19  ;;  %v691_v0 = vrot.slane %v690_v62, 2 }
 0x15d   : > { %v621_v58 = vrot.slane %v620_v56, 1  ;;  %v692_v1 = vadd.f32 %v691_v0, %v690_v62 }
 0x15f   : > { %v622_v61 = vadd.f32 %v621_v58, %v620_v56  ;;  %v693_v2 = vrot.slane %v692_v1, 1 }
 0x161   : > { %v623_v63 = vadd.f32 %v622_v61, %v585_v59  ;;  %v694_v4 = vadd.f32 %v693_v2, %v692_v1 }
 0x163   : > { %624 = vst [vmem:[#allocation2] sm:$0x1] %v623_v63  ;;  %v695_v5 = vadd.f32 %v694_v4, %v625_v3 }
 0x165   : > { %696 = vst [vmem:[#allocation3] sm:$0x1] %v695_v5 }
 0x166 PF: > { %p729_p4 = scmp.eq.s32.totalorder %s1292_s19, 1 }
 0x168   : > { %p730_p5 = pnand %p729_p4, %p575_p0 }
 0x169   : > { %v743_v14 = vld [vmem:[%s1876_s2] sm:$0x1] (!%p730_p5) }
 0x16a   : > { %733 = sbr.rel (%p730_p5) target bundleno = 391 (0x187), region = 48  ;;  %v734_v6 = vld [vmem:[#allocation2] sm:$0x1] (!%p730_p5) }
 0x16b   : > { %v735_v8 = vmul.f32 (!%p730_p5), 0.001953125, %v734_v6  ;;  %v746_v17 = vld [vmem:[%s1877_s3] sm:$0x1] (!%p730_p5) }
 0x16c   : > { %v736_v7 = vld [vmem:[#allocation3] sm:$0x1] (!%p730_p5) }
 0x16d   : > { %v737_v9 = vmul.f32 (!%p730_p5), 0.001953125, %v736_v7  ;;  %v738_v10 = vmul.f32 (!%p730_p5), %v735_v8, %v735_v8 }
 0x16f   : > { %v739_v11 = vsub.f32 (!%p730_p5), %v737_v9, %v738_v10 }
 0x171   : > { %v740_v12 = vmax.f32 %v739_v11, 0.0 }
 0x173   : > { %v741_v13 = vadd.f32 1e-05, %v740_v12 }
 0x175   : > { %1208 = vrsqrt.f32 %v741_v13 }
 0x17f   : > { %v1209_v15 = vpop.eup %1208 }
 0x180   : > { %v744_v16 = vmul.f32 %v1209_v15, %v743_v14 }
 0x182   : > { %745 = vst [vmem:[#allocation4] sm:$0x1] %v744_v16  ;;  %v747_v18 = vmul.f32 %v744_v16, %v735_v8 }
 0x184   : > { %v748_v19 = vsub.f32 %v746_v17, %v747_v18 }
 0x186   : > { %749 = vst [vmem:[#allocation5] sm:$0x1] %v748_v19 }
 0x187 PF: > { %p1028_p6 = scmp.ne.s32.totalorder %s1292_s19, 1 }
 0x189   : > { %752 = sbr.rel (%p1028_p6) target bundleno = 424 (0x1a8), region = 52  ;;  %v1679_v20 = vld [vmem:[#allocation4] ss:$0 sm:$0xff] (!%p1028_p6) }
 0x18a   : > { %v760_v54 = vmul.f32 (!%p1028_p6), %v1679_v20, %v1475_v24  ;;  %v761_v55 = vmul.f32 (!%p1028_p6), %v1679_v20, %v1483_v28  ;;  %v762_v56 = vmul.f32 (!%p1028_p6), %v1471_v22, %v1679_v20  ;;  %v763_v57 = vmul.f32 (!%p1028_p6), %v1479_v26, %v1679_v20 }
 0x18b   : > { %v764_v58 = vmul.f32 (!%p1028_p6), %v1679_v20, %v1491_v32  ;;  %v765_v59 = vmul.f32 (!%p1028_p6), %v1679_v20, %v1499_v36  ;;  %v766_v60 = vmul.f32 (!%p1028_p6), %v1487_v30, %v1679_v20  ;;  %v767_v24 = vmul.f32 (!%p1028_p6), %v1495_v34, %v1679_v20 }
 0x18c   : > { %v768_v6 = vmul.f32 (!%p1028_p6), %v1679_v20, %v1507_v40  ;;  %v769_v7 = vmul.f32 (!%p1028_p6), %v1679_v20, %v1515_v44  ;;  %v770_v8 = vmul.f32 (!%p1028_p6), %v1503_v38, %v1679_v20  ;;  %v771_v9 = vmul.f32 (!%p1028_p6), %v1511_v42, %v1679_v20 }
 0x18d   : > { %v1681_v21 = vld [vmem:[#allocation5] ss:$0 sm:$0xff] (!%p1028_p6)  ;;  %v772_v10 = vmul.f32 (!%p1028_p6), %v1679_v20, %v1523_v48  ;;  %v773_v11 = vmul.f32 (!%p1028_p6), %v1679_v20, %v1531_v52  ;;  %v774_v40 = vmul.f32 (!%p1028_p6), %v1519_v46, %v1679_v20  ;;  %v775_v44 = vmul.f32 (!%p1028_p6), %v1527_v50, %v1679_v20 }
 0x18e   : > { %v799_v28 = vadd.f32 (!%p1028_p6), %v1681_v21, %v760_v54  ;;  %v800_v22 = vadd.f32 (!%p1028_p6), %v1681_v21, %v761_v55  ;;  %v801_v26 = vadd.f32 (!%p1028_p6), %v1681_v21, %v762_v56  ;;  %v802_v32 = vadd.f32 (!%p1028_p6), %v1681_v21, %v763_v57 }
 0x18f   : > { %v803_v36 = vadd.f32 (!%p1028_p6), %v1681_v21, %v764_v58  ;;  %v804_v61 = vadd.f32 (!%p1028_p6), %v1681_v21, %v765_v59  ;;  %v805_v30 = vadd.f32 (!%p1028_p6), %v1681_v21, %v766_v60  ;;  %v806_v34 = vadd.f32 (!%p1028_p6), %v1681_v21, %v767_v24 }
 0x190   : > { %v831_v62 = vmax.f32 %v799_v28, 0.0  ;;  %v832_v63 = vmax.f32 %v800_v22, 0.0  ;;  %v833_v0 = vmax.f32 %v801_v26, 0.0  ;;  %v834_v1 = vmax.f32 %v802_v32, 0.0 }
 0x191   : > { %v835_v2 = vmax.f32 %v803_v36, 0.0  ;;  %v836_v3 = vmax.f32 %v804_v61, 0.0  ;;  %v837_v4 = vmax.f32 %v805_v30, 0.0  ;;  %v838_v5 = vmax.f32 %v806_v34, 0.0 }
 0x192   : > { %863 = vst [vmem:[%s1536_s13] sm:$0xff] %v831_v62  ;;  %864 = vst [vmem:[%s1536_s13 + $0x8] sm:$0xff] %v832_v63  ;;  %v807_v38 = vadd.f32 %v1681_v21, %v768_v6  ;;  %v808_v42 = vadd.f32 %v1681_v21, %v769_v7  ;;  %v809_v12 = vadd.f32 %v1681_v21, %v770_v8 }
 0x193   : > { %865 = vst [vmem:[%s1536_s13 + $0x10] sm:$0xff] %v833_v0  ;;  %866 = vst [vmem:[%s1536_s13 + $0x18] sm:$0xff] %v834_v1  ;;  %v810_v48 = vadd.f32 %v1681_v21, %v771_v9  ;;  %v811_v52 = vadd.f32 %v1681_v21, %v772_v10  ;;  %v812_v13 = vadd.f32 %v1681_v21, %v773_v11 }
 0x194   : > { %867 = vst [vmem:[%s1536_s13 + $0x20] sm:$0xff] %v835_v2  ;;  %868 = vst [vmem:[%s1536_s13 + $0x28] sm:$0xff] %v836_v3  ;;  %v813_v46 = vadd.f32 %v1681_v21, %v774_v40  ;;  %v814_v50 = vadd.f32 %v1681_v21, %v775_v44  ;;  %v839_v14 = vmax.f32 %v807_v38, 0.0  ;;  %v840_v15 = vmax.f32 %v808_v42, 0.0 }
 0x195   : > { %869 = vst [vmem:[%s1536_s13 + $0x30] sm:$0xff] %v837_v4  ;;  %870 = vst [vmem:[%s1536_s13 + $0x38] sm:$0xff] %v838_v5  ;;  %v841_v16 = vmax.f32 %v809_v12, 0.0  ;;  %v842_v17 = vmax.f32 %v810_v48, 0.0  ;;  %v843_v18 = vmax.f32 %v811_v52, 0.0  ;;  %v844_v19 = vmax.f32 %v812_v13, 0.0 }
 0x196   : > { %v845_v54 = vmax.f32 %v813_v46, 0.0  ;;  %v846_v55 = vmax.f32 %v814_v50, 0.0  ;;  %871 = vst [vmem:[%s1536_s13 + $0x40] sm:$0xff] %v839_v14  ;;  %872 = vst [vmem:[%s1536_s13 + $0x48] sm:$0xff] %v840_v15  ;;  %v776_v56 = vmul.f32 %v1679_v20, %v1477_v25  ;;  %v777_v57 = vmul.f32 %v1679_v20, %v1485_v29 }
 0x197   : > { %873 = vst [vmem:[%s1536_s13 + $0x50] sm:$0xff] %v841_v16  ;;  %874 = vst [vmem:[%s1536_s13 + $0x58] sm:$0xff] %v842_v17  ;;  %v778_v58 = vmul.f32 %v1473_v23, %v1679_v20  ;;  %v779_v59 = vmul.f32 %v1481_v27, %v1679_v20  ;;  %v780_v60 = vmul.f32 %v1679_v20, %v1493_v33 }
 0x198   : > { %875 = vst [vmem:[%s1536_s13 + $0x60] sm:$0xff] %v843_v18  ;;  %876 = vst [vmem:[%s1536_s13 + $0x68] sm:$0xff] %v844_v19  ;;  %v781_v24 = vmul.f32 %v1679_v20, %v1501_v37  ;;  %v782_v25 = vmul.f32 %v1489_v31, %v1679_v20  ;;  %v783_v29 = vmul.f32 %v1497_v35, %v1679_v20 }
 0x199   : > { %877 = vst [vmem:[%s1536_s13 + $0x70] sm:$0xff] %v845_v54  ;;  %878 = vst [vmem:[%s1536_s13 + $0x78] sm:$0xff] %v846_v55  ;;  %v815_v23 = vadd.f32 %v1681_v21, %v776_v56  ;;  %v816_v27 = vadd.f32 %v1681_v21, %v777_v57  ;;  %v817_v28 = vadd.f32 %v1681_v21, %v778_v58 }
 0x19a   : > { %v818_v33 = vadd.f32 %v1681_v21, %v779_v59  ;;  %v819_v37 = vadd.f32 %v1681_v21, %v780_v60  ;;  %v820_v22 = vadd.f32 %v1681_v21, %v781_v24  ;;  %v821_v31 = vadd.f32 %v1681_v21, %v782_v25 }
 0x19b   : > { %v822_v35 = vadd.f32 %v1681_v21, %v783_v29  ;;  %v847_v26 = vmax.f32 %v815_v23, 0.0  ;;  %v848_v32 = vmax.f32 %v816_v27, 0.0  ;;  %v849_v36 = vmax.f32 %v817_v28, 0.0 }
 0x19c   : > { %v850_v61 = vmax.f32 %v818_v33, 0.0  ;;  %v851_v30 = vmax.f32 %v819_v37, 0.0  ;;  %v852_v34 = vmax.f32 %v820_v22, 0.0  ;;  %v853_v62 = vmax.f32 %v821_v31, 0.0 }
 0x19d   : > { %v854_v63 = vmax.f32 %v822_v35, 0.0  ;;  %879 = vst [vmem:[%s1536_s13 + $0x80] sm:$0xff] %v847_v26  ;;  %880 = vst [vmem:[%s1536_s13 + $0x88] sm:$0xff] %v848_v32  ;;  %v784_v0 = vmul.f32 %v1679_v20, %v1509_v41  ;;  %v785_v1 = vmul.f32 %v1679_v20, %v1517_v45  ;;  %v786_v2 = vmul.f32 %v1505_v39, %v1679_v20 }
 0x19e   : > { %881 = vst [vmem:[%s1536_s13 + $0x90] sm:$0xff] %v849_v36  ;;  %882 = vst [vmem:[%s1536_s13 + $0x98] sm:$0xff] %v850_v61  ;;  %v787_v3 = vmul.f32 %v1513_v43, %v1679_v20  ;;  %v788_v4 = vmul.f32 %v1679_v20, %v1525_v49  ;;  %v789_v5 = vmul.f32 %v1679_v20, %v1533_v53 }
 0x19f   : > { %883 = vst [vmem:[%s1536_s13 + $0xa0] sm:$0xff] %v851_v30  ;;  %884 = vst [vmem:[%s1536_s13 + $0xa8] sm:$0xff] %v852_v34  ;;  %v790_v41 = vmul.f32 %v1521_v47, %v1679_v20  ;;  %v791_v45 = vmul.f32 %v1529_v51, %v1679_v20  ;;  %v823_v39 = vadd.f32 %v1681_v21, %v784_v0 }
 0x1a0   : > { %885 = vst [vmem:[%s1536_s13 + $0xb0] sm:$0xff] %v853_v62  ;;  %886 = vst [vmem:[%s1536_s13 + $0xb8] sm:$0xff] %v854_v63  ;;  %v824_v43 = vadd.f32 %v1681_v21, %v785_v1  ;;  %v825_v6 = vadd.f32 %v1681_v21, %v786_v2  ;;  %v826_v49 = vadd.f32 %v1681_v21, %v787_v3 }
 0x1a1   : > { %v827_v53 = vadd.f32 %v1681_v21, %v788_v4  ;;  %v828_v47 = vadd.f32 %v1681_v21, %v789_v5  ;;  %v829_v51 = vadd.f32 %v1681_v21, %v790_v41  ;;  %v830_v20 = vadd.f32 %v1681_v21, %v791_v45 }
 0x1a2   : > { %v855_v7 = vmax.f32 %v823_v39, 0.0  ;;  %v856_v8 = vmax.f32 %v824_v43, 0.0  ;;  %v857_v9 = vmax.f32 %v825_v6, 0.0  ;;  %v858_v10 = vmax.f32 %v826_v49, 0.0 }
 0x1a3   : > { %v859_v11 = vmax.f32 %v827_v53, 0.0  ;;  %v860_v40 = vmax.f32 %v828_v47, 0.0  ;;  %v861_v44 = vmax.f32 %v829_v51, 0.0  ;;  %v862_v38 = vmax.f32 %v830_v20, 0.0 }
 0x1a4   : > { %887 = vst [vmem:[%s1536_s13 + $0xc0] sm:$0xff] %v855_v7  ;;  %888 = vst [vmem:[%s1536_s13 + $0xc8] sm:$0xff] %v856_v8 }
 0x1a5   : > { %889 = vst [vmem:[%s1536_s13 + $0xd0] sm:$0xff] %v857_v9  ;;  %890 = vst [vmem:[%s1536_s13 + $0xd8] sm:$0xff] %v858_v10 }
 0x1a6   : > { %891 = vst [vmem:[%s1536_s13 + $0xe0] sm:$0xff] %v859_v11  ;;  %892 = vst [vmem:[%s1536_s13 + $0xe8] sm:$0xff] %v860_v40 }
 0x1a7   : > { %893 = vst [vmem:[%s1536_s13 + $0xf0] sm:$0xff] %v861_v44  ;;  %894 = vst [vmem:[%s1536_s13 + $0xf8] sm:$0xff] %v862_v38 }
 0x1a8 PF: > { %s1036_s19 = sshll.u32 %s1288_s18, 12  ;;  %s909_s8 = sshll.u32 %s1536_s13, 4  ;;  %s1818_s8 = int_to_ptr.vmem [resolvable:$true] %s909_s8 }
 0x1a9   : > { %s1815_s7 = scalar_lea.hbm %s1878_s4, %s1036_s19  ;;  %s1822_s10 = scalar_lea.sflag [#allocation7], %s201_s6 }
 0x1aa   : > { %s1210_s11 = scalar_lea.vmem %s1818_s8, 4096  ;;  %s1308_s18 = smov [#allocation6]  }
 0x1ab   : > { %p1211_p7 = scmp.ne.s32.totalorder %s1818_s8, %s1210_s11  ;;  %s1214_s12 = sshll.u32 %s1308_s18, 4  ;;  %s1215_s12 = int_to_ptr.vmem [resolvable:$false] %s1214_s12 }
 0x1ac   : > { %s1216_s9 = scalar_lea.vmem %s1215_s12, 8192  ;;  %p1217_p11 = scmp.lt.s32.totalorder %s1818_s8, %s1215_s12 }
 0x1ad   : > { %p1212_p9 = pnand %p1211_p7, %p1388_p3  ;;  %p1218_p12 = scmp.lt.s32.totalorder %s1216_s9, %s1210_s11 }
 0x1af   : > { %p1213_p10 = pneg %p1212_p9  ;;  %p1219_p13 = por %p1218_p12, %p1217_p11 }
 0x1b1   : > { %p1220_p0 = pnand %p1219_p13, %p1213_p10 }
 0x1b3   : > { %1223 = shalt.err (!%p1220_p0)
}
 0x1b4   : > { %s1224_s6 = scalar_lea.hbm %s1815_s7, 4096  ;;  %s1228_s23 = scalar_lea.hbm %s1878_s4, 8192 }
 0x1b5   : > { %p1225_p1 = scmp.ne.s32.totalorder %s1815_s7, %s1224_s6  ;;  %p1229_p5 = scmp.lt.u32.totalorder %s1815_s7, %s1878_s4 }
 0x1b6   : > { %p1230_p6 = scmp.lt.u32.totalorder %s1228_s23, %s1224_s6  ;;  %p1232_p9 = scmp.lt.u32.totalorder %s1224_s6, %s1815_s7 }
 0x1b7   : > { %p1226_p2 = pnand %p1225_p1, %p1388_p3 }
 0x1b8   : > { %p1231_p7 = por %p1230_p6, %p1229_p5 }
 0x1b9   : > { %p1227_p4 = pneg %p1226_p2 }
 0x1ba   : > { %p1233_p10 = por %p1232_p9, %p1231_p7 }
 0x1bc   : > { %p1234_p11 = pnand %p1233_p10, %p1227_p4 }
 0x1be   : > { %1237 = shalt.err (!%p1234_p11)
}
 0x1bf   : > { %s1309_s27 = smov 128   ;;  %s1310_s28 = smov 8  }
 0x1c0   : > { %1112 = dma.vmem_to_hbm [thread:$0]  (%p1388_p3), %s1818_s8, 4096, %s1815_s7, %s1822_s10, %s1309_s27, %s1309_s27, %s1310_s28  }
 0x1c1 PF: > { %p1118_p12 = scmp.ge.s32.totalorder %s1304_s22, 2  ;;  %s924_s11 = sand.u32 1, %s1276_s15  }
 0x1c2   : > { %s925_s18 = scalar_lea.sflag [#allocation7], %s924_s11 }
 0x1c3   : > { %p1115_p13 = pnand %p1118_p12, %p1399_p8 }
 0x1c5   : > { %1271 = dma.done.wait (!%p1115_p13), %s925_s18, 4096  }
 0x1c6   : > { %1273 = vsyncadd (!%p1115_p13), %s925_s18, 4294963200  ;;  %s17_s22 = sadd.s32 1, %s1304_s22   ;;  %s1882_s15 = smov %s1280_s16 }
 0x1c7   : > { %p14_p0 = scmp.ge.s32.totalorder %s17_s22, 6   ;;  %s1883_s16 = smov %s1284_s17 }
 0x1c8   : > { %s1884_s17 = smov %s1397_s30  ;;  %s1885_s18 = smov %s1296_s20 }
 0x1c9   : > { %s1886_s19 = smov %s1300_s21  ;;  %s1887_s20 = smov %s1890_s25 }
 0x1ca   : > { %s1888_s21 = smov %s1894_s26  ;;  %16 = sbr.rel (!%p14_p0) target bundleno = 5 (0x5), region = 87 }
 0x1d1   :  { %930 = vsyncpa [#allocation7], 1 }
 0x1d2   :  { %932 = vsyncpa [#allocation7 + $0x1], 1 }

</bundles_post_ra>
